<compile_context>
chip_gen: v7x
topology: tpu7x:2x2x1
jax: 0.10.0
libtpu: 0.0.40
codegen_flags: <defaults>
</compile_context>

<pallas_src>
import functools

import jax
import jax.numpy as jnp
from jax.experimental import pallas as pl
from jax.experimental.pallas import tpu as pltpu


def _pick_tile(n, target, quantum):
    """Largest divisor of n that is <= target and a multiple of quantum; else n (full extent,
    which is always layout-legal)."""
    for cand in range(min(n, target), 0, -1):
        if n % cand == 0 and cand % quantum == 0:
            return cand
    return n


# ---------------------------------------------------------------------------
# Tiled / pipelined projection matmul
# ---------------------------------------------------------------------------
def _matmul_kernel(x_ref, w_ref, o_ref, acc_ref):
    @pl.when(pl.program_id(2) == 0)
    def _():
        acc_ref[...] = jnp.zeros(acc_ref.shape, jnp.float32)

    acc_ref[...] += jnp.dot(
        x_ref[...], w_ref[...], preferred_element_type=jnp.float32
    )

    @pl.when(pl.program_id(2) == pl.num_programs(2) - 1)
    def _():
        o_ref[...] = acc_ref[...].astype(o_ref.dtype)


def _matmul(x, w, *, tm=512, tn=512, tk=512):
    """x @ w, tiled over (M, N, K) with a float32 VMEM accumulator.
    Operands keep their dtype (bf16 stays bf16 on the MXU), accumulation is f32."""
    M, K = x.shape
    K2, N = w.shape
    assert K == K2
    bm = _pick_tile(M, tm, 8)      # second-to-last dim of x/out blocks -> sublane quantum
    bn = _pick_tile(N, tn, 128)    # last dim of w/out blocks -> lane quantum
    bk = _pick_tile(K, tk, 128)    # last dim of x block / second-to-last of w block

    return pl.pallas_call(
        _matmul_kernel,
        out_shape=jax.ShapeDtypeStruct((M, N), x.dtype),
        grid_spec=pltpu.PrefetchScalarGridSpec(
            num_scalar_prefetch=0,
            grid=(M // bm, N // bn, K // bk),
            in_specs=[
                pl.BlockSpec((bm, bk), lambda i, j, k: (i, k)),
                pl.BlockSpec((bk, bn), lambda i, j, k: (k, j)),
            ],
            out_specs=pl.BlockSpec((bm, bn), lambda i, j, k: (i, j)),
            scratch_shapes=[pltpu.VMEM((bm, bn), jnp.float32)],
        ),
        compiler_params=pltpu.CompilerParams(
            dimension_semantics=("parallel", "parallel", "arbitrary"),
            vmem_limit_bytes=64 * 1024 * 1024,
        ),
    )(x, w)


# ---------------------------------------------------------------------------
# Flash-style GQA attention kernel with fused rotate-half rotary
# ---------------------------------------------------------------------------
def _flash_attn_kernel(q_ref, kv_ref, cosq_ref, sinq_ref, cosk_ref, sink_ref, o_ref,
                       qrot_ref, acc_ref, m_ref, l_ref, *,
                       B, KVH, n_rep, D, tq, tk, mxu_dtype):
    qi = pl.program_id(0)
    kv = pl.program_id(1)
    nkv = pl.num_programs(1)
    KVD = KVH * D
    H = KVH * n_rep

    # (D, D) half-swap permutation (rotate-half; the sign lives in sin_ref).
    r = jax.lax.broadcasted_iota(jnp.int32, (D, D), 0)
    c = jax.lax.broadcasted_iota(jnp.int32, (D, D), 1)
    hs = (((r + D // 2) % D) == c).astype(jnp.float32)

    def rope(x, cos, sin):                       # x/cos/sin: (rows, D) float32
        return x * cos + jnp.dot(x, hs, preferred_element_type=jnp.float32) * sin

    # ---- per-q-tile init: reset stats, rope Q once and cache it (stacked per group) ----
    @pl.when(kv == 0)
    def _():
        m_ref[...] = jnp.full(m_ref.shape, -jnp.inf, jnp.float32)
        l_ref[...] = jnp.zeros(l_ref.shape, jnp.float32)
        acc_ref[...] = jnp.zeros(acc_ref.shape, jnp.float32)
        cq = cosq_ref[...].astype(jnp.float32)
        sq = sinq_ref[...].astype(jnp.float32)
        for b in range(B):
            for g in range(KVH):
                for rr in range(n_rep):
                    h = g * n_rep + rr
                    qh = q_ref[:, b, h * D:(h + 1) * D].astype(jnp.float32)
                    qrot_ref[b, g, rr * tq:(rr + 1) * tq, :] = (
                        rope(qh, cq, sq).astype(mxu_dtype))

    q_end = (qi + 1) * tq - 1                    # last global query row of this tile
    kv_start = kv * tk

    # ---- online-softmax update (skipped entirely for fully-masked causal tiles) ----
    @pl.when(kv_start <= q_end)
    def _():
        rows = jax.lax.broadcasted_iota(jnp.int32, (n_rep * tq, tk), 0)
        cols = jax.lax.broadcasted_iota(jnp.int32, (n_rep * tq, tk), 1)
        visible = (kv_start + cols) <= (qi * tq + rows % tq)

        ck = cosk_ref[...].astype(jnp.float32)
        sk = sink_ref[...].astype(jnp.float32)

        for b in range(B):
            for g in range(KVH):
                kb = kv_ref[:, b, g * D:(g + 1) * D].astype(jnp.float32)
                k_rot = rope(kb, ck, sk).astype(mxu_dtype)
                vb = kv_ref[:, b, KVD + g * D: KVD + (g + 1) * D].astype(mxu_dtype)

                qs = qrot_ref[b, g]                                  # (n_rep*tq, D)
                s = jax.lax.dot_general(
                    qs, k_rot, (((1,), (1,)), ((), ())),
                    preferred_element_type=jnp.float32)              # (n_rep*tq, tk)
                s = jnp.where(visible, s, -jnp.inf)

                m_prev = m_ref[b, g]
                m_new = jnp.maximum(m_prev, jnp.max(s, axis=-1, keepdims=True))
                alpha = jnp.exp(m_prev - m_new)
                p = jnp.exp(s - m_new)
                l_ref[b, g] = alpha * l_ref[b, g] + jnp.sum(p, axis=-1, keepdims=True)
                acc_ref[b, g] = alpha * acc_ref[b, g] + jnp.dot(
                    p.astype(mxu_dtype), vb, preferred_element_type=jnp.float32)
                m_ref[b, g] = m_new

    # ---- finalize: exact normalization + one lane-dense (tq, E) store per batch ----
    @pl.when(kv == nkv - 1)
    def _():
        for b in range(B):
            pieces = []
            for g in range(KVH):
                og = acc_ref[b, g] * (1.0 / l_ref[b, g])             # (n_rep*tq, D)
                for rr in range(n_rep):
                    pieces.append(og[rr * tq:(rr + 1) * tq, :])
            o_ref[:, b, :] = jnp.concatenate(pieces, axis=-1).astype(o_ref.dtype)


def _flash_attention(q, kv, cos_cat, sin_rh, *, B, T, E, H, KVH, D, out_dtype,
                     block_q=128, block_k=128):
    n_rep = H // KVH
    KVD = KVH * D
    tq = _pick_tile(T, block_q, 8)
    tk = _pick_tile(T, block_k, 8)
    nq, nk = T // tq, T // tk
    mxu_dtype = jnp.bfloat16 if q.dtype == jnp.bfloat16 else jnp.float32

    kernel = functools.partial(
        _flash_attn_kernel, B=B, KVH=KVH, n_rep=n_rep, D=D, tq=tq, tk=tk,
        mxu_dtype=mxu_dtype)

    def kv_block_idx(qi, kv):
        # Clamp skipped (fully-masked) causal tiles onto the last useful block index so
        # their DMA is never issued (block index does not change -> no re-fetch).
        return jnp.minimum(kv, ((qi + 1) * tq - 1) // tk)

    return pl.pallas_call(
        kernel,
        grid=(nq, nk),
        in_specs=[
            pl.BlockSpec((tq, B, E), lambda qi, kv: (qi, 0, 0)),            # q rows
            pl.BlockSpec((tk, B, 2 * KVD),
                         lambda qi, kv: (kv_block_idx(qi, kv), 0, 0)),      # [k | v] rows
            pl.BlockSpec((tq, D), lambda qi, kv: (qi, 0)),                  # cos @ q rows
            pl.BlockSpec((tq, D), lambda qi, kv: (qi, 0)),                  # sin @ q rows
            pl.BlockSpec((tk, D), lambda qi, kv: (kv_block_idx(qi, kv), 0)),  # cos @ kv rows
            pl.BlockSpec((tk, D), lambda qi, kv: (kv_block_idx(qi, kv), 0)),  # sin @ kv rows
        ],
        out_specs=pl.BlockSpec((tq, B, E), lambda qi, kv: (qi, 0, 0)),
        out_shape=jax.ShapeDtypeStruct((T, B, E), out_dtype),
        scratch_shapes=[
            pltpu.VMEM((B, KVH, n_rep * tq, D), mxu_dtype),   # cached roped Q (stacked heads)
            pltpu.VMEM((B, KVH, n_rep * tq, D), jnp.float32),  # output accumulator
            pltpu.VMEM((B, KVH, n_rep * tq, 1), jnp.float32),  # running max
            pltpu.VMEM((B, KVH, n_rep * tq, 1), jnp.float32),  # running denom
        ],
        compiler_params=pltpu.CompilerParams(
            dimension_semantics=("parallel", "arbitrary"),
            vmem_limit_bytes=64 * 1024 * 1024,
        ),
    )(q, kv, cos_cat, sin_rh, cos_cat, sin_rh)


# ---------------------------------------------------------------------------
# Wrapper reproducing MultiheadAttention.forward
# ---------------------------------------------------------------------------
def multihead_attention(query, key, value, cos, sin, wq, wk, wv, wo,
                        num_heads, num_kv_heads=None):
    """query/key/value: (T, B, E).  cos/sin: (T, head_dim // 2).  Returns (T, B, E)."""
    T, B, E = query.shape
    H = num_heads
    KVH = num_kv_heads if num_kv_heads is not None else num_heads
    D = E // H
    KVD = KVH * D
    scaling = float(D) ** -0.5

    # Fold the interleaved-pair permutation into Wq/Wk (deinterleave each head's output
    # rows).  Scores are invariant because Q and K get the same per-head permutation.
    d_perm = jnp.concatenate([jnp.arange(0, D, 2), jnp.arange(1, D, 2)])
    rows_q = (jnp.arange(H)[:, None] * D + d_perm[None, :]).reshape(-1)
    rows_k = (jnp.arange(KVH)[:, None] * D + d_perm[None, :]).reshape(-1)
    wq_p = (wq[rows_q, :] * scaling).astype(wq.dtype)   # 1/sqrt(D) folded in (rope is linear)
    wk_p = wk[rows_k, :]

    # Row-wise projections on the seq-first flattening -- no (T,B,E)->(B,T,E) transposes.
    x_q = query.reshape(T * B, E)
    q = _matmul(x_q, wq_p.T).reshape(T, B, E)

    if key is value:
        w_kv = jnp.concatenate([wk_p, wv], axis=0)             # (2*KVD, E): fused K|V proj
        kv = _matmul(key.reshape(T * B, E), w_kv.T)
    else:
        k = _matmul(key.reshape(T * B, E), wk_p.T)
        v = _matmul(value.reshape(T * B, E), wv.T)
        kv = jnp.concatenate([k, v], axis=-1)
    kv = kv.reshape(T, B, 2 * KVD)

    # rotate-half rotary tables for the deinterleaved layout:
    #   cos_cat = [cos | cos],  sin_rh = [-sin | sin]  (rotate-half sign folded in)
    cos_cat = jnp.concatenate([cos, cos], axis=-1).astype(jnp.float32)
    sin_rh = jnp.concatenate([-sin, sin], axis=-1).astype(jnp.float32)

    attn = _flash_attention(q, kv, cos_cat, sin_rh, B=B, T=T, E=E, H=H,
                            KVH=KVH, D=D, out_dtype=query.dtype)   # (T, B, E)

    out = _matmul(attn.reshape(T * B, E), wo.T).reshape(T, B, E)
    return out


# ---------------------------------------------------------------------------
# Pure-JAX reference (mirrors the PyTorch module) for a correctness spot-check
# ---------------------------------------------------------------------------
def _reference(query, key, value, cos, sin, wq, wk, wv, wo, H, KVH):
    T, B, E = query.shape
    D = E // H
    n_rep = H // KVH
    scaling = float(D) ** -0.5
    hp = jax.lax.Precision.HIGHEST

    q = jnp.einsum('tbe,fe->btf', query, wq, precision=hp).reshape(B, T, H, D)
    k = jnp.einsum('tbe,fe->btf', key, wk, precision=hp).reshape(B, T, KVH, D)
    v = jnp.einsum('tbe,fe->btf', value, wv, precision=hp).reshape(B, T, KVH, D)

    cos_e = jnp.repeat(cos, 2, axis=-1)[None, :, None, :]
    sin_e = jnp.repeat(sin, 2, axis=-1)[None, :, None, :]

    def rope(x):
        x2 = x.reshape(x.shape[:-1] + (D // 2, 2))
        xs = jnp.stack([-x2[..., 1], x2[..., 0]], axis=-1).reshape(x.shape)
        return x * cos_e + xs * sin_e

    q = rope(q).transpose(0, 2, 1, 3) * scaling
    k = jnp.repeat(rope(k).transpose(0, 2, 1, 3), n_rep, axis=1)
    v = jnp.repeat(v.transpose(0, 2, 1, 3), n_rep, axis=1)

    s = jnp.einsum('bhtd,bhsd->bhts', q, k, precision=hp)
    s = s + jnp.triu(jnp.full((T, T), -jnp.inf, dtype=jnp.float32), 1)
    p = jax.nn.softmax(s, axis=-1)
    a = jnp.einsum('bhts,bhsd->bhtd', p, v, precision=hp)
    a = a.transpose(0, 2, 1, 3).reshape(B, T, E)
    out = jnp.einsum('bte,fe->btf', a, wo, precision=hp)
    return out.transpose(1, 0, 2)


# ---------------------------------------------------------------------------
if __name__ == "__main__":
    # module config:  embed_dim=32, num_heads=4, num_kv_heads=2 -> head_dim=8, n_rep=2
    E, H, KVH = 32, 4, 2
    T, B = 8, 2
    D = E // H
    n_rep = H // KVH

    root = jax.random.PRNGKey(0)
    keys = jax.random.split(root, 5)

    # self-attention style input (query = key = value) -> exercises the fused K|V path
    x = jax.random.normal(keys[0], (T, B, E), jnp.float32)

    # deterministic parameter init (nn.Linear weight shapes, bias=False)
    wq = jax.random.normal(keys[1], (E, E), jnp.float32) * 0.1           # q_proj
    wk = jax.random.normal(keys[2], (E // n_rep, E), jnp.float32) * 0.1  # k_proj
    wv = jax.random.normal(keys[3], (E // n_rep, E), jnp.float32) * 0.1  # v_proj
    wo = jax.random.normal(keys[4], (E, E), jnp.float32) * 0.1           # out_proj

    # rel_pos = (cos, sin) for rotary, shape (T, head_dim // 2), rotary_dim == head_dim
    pos = jnp.arange(T, dtype=jnp.float32)[:, None]
    inv_freq = 1.0 / (10000.0 ** (jnp.arange(0, D, 2, dtype=jnp.float32) / D))
    angles = pos * inv_freq[None, :]
    cos = jnp.cos(angles)
    sin = jnp.sin(angles)

    out = multihead_attention(x, x, x, cos, sin, wq, wk, wv, wo, H, KVH)
    jax.block_until_ready(out)
    assert out.shape == (T, B, E)

    ref = _reference(x, x, x, cos, sin, wq, wk, wv, wo, H, KVH)
    max_err = float(jnp.max(jnp.abs(out - ref)))
    assert max_err < 5e-2, f"max abs error vs reference: {max_err}"

    print("KERNEL_OK")
</pallas_src>

<mosaic_0001>
module attributes {stable_mosaic.version = 11 : i64} {
  func.func @_matmul_kernel(%arg0: i32, %arg1: i32, %arg2: i32, %arg3: memref<16x32xf32, #tpu.memory_space<vmem>>, %arg4: memref<32x32xf32, #tpu.memory_space<vmem>>, %arg5: memref<16x32xf32, #tpu.memory_space<vmem>>, %arg6: memref<16x32xf32, #tpu.memory_space<vmem>>) attributes {dimension_semantics = [#tpu.dimension_semantics<parallel>, #tpu.dimension_semantics<parallel>, #tpu.dimension_semantics<arbitrary>], iteration_bounds = array<i64: 1, 1, 1>, scalar_prefetch = 0 : i64, scratch_operands = 1 : i64, tpu.core_type = #tpu.core_type<tc>, window_params = [{transform_indices = @transform_0, window_bounds = array<i64: 16, 32>}, {transform_indices = @transform_1, window_bounds = array<i64: 32, 32>}, {transform_indices = @transform_2, window_bounds = array<i64: 16, 32>}]} {
    %c0_i32 = arith.constant 0 : i32
    %0 = arith.cmpi eq, %arg2, %c0_i32 : i32
    %1 = arith.extui %0 : i1 to i32
    %c0_i32_0 = arith.constant 0 : i32
    %2 = arith.cmpi ne, %1, %c0_i32_0 : i32
    scf.if %2 {
      %cst_10 = arith.constant 0.000000e+00 : f32
      %12 = vector.broadcast %cst_10 : f32 to vector<16x32xf32>
      %c0_11 = arith.constant 0 : index
      %c0_12 = arith.constant 0 : index
      %13 = vector.load %arg6[%c0_11, %c0_12] : memref<16x32xf32, #tpu.memory_space<vmem>>, vector<16x32xf32>
      tpu.vector_store %arg6[%c0_11, %c0_12], %12 {strides = array<i32>} : memref<16x32xf32, #tpu.memory_space<vmem>>, vector<16x32xf32>,
    } else {
    }
    %c0 = arith.constant 0 : index
    %c0_1 = arith.constant 0 : index
    %3 = vector.load %arg6[%c0, %c0_1] : memref<16x32xf32, #tpu.memory_space<vmem>>, vector<16x32xf32>
    %c0_2 = arith.constant 0 : index
    %c0_3 = arith.constant 0 : index
    %4 = vector.load %arg3[%c0_2, %c0_3] : memref<16x32xf32, #tpu.memory_space<vmem>>, vector<16x32xf32>
    %c0_4 = arith.constant 0 : index
    %c0_5 = arith.constant 0 : index
    %5 = vector.load %arg4[%c0_4, %c0_5] : memref<32x32xf32, #tpu.memory_space<vmem>>, vector<32x32xf32>
    %cst = arith.constant dense<0.000000e+00> : vector<16x32xf32>
    %6 = tpu.matmul %4, %5, %cst {dimension_numbers = #tpu.dot_dimension_numbers<[1], [0], [0], [1], [0, 0, 1, 1], [], []>} : vector<16x32xf32>, vector<32x32xf32>, vector<16x32xf32> -> vector<16x32xf32>
    %7 = arith.addf %3, %6 : vector<16x32xf32>
    %c0_6 = arith.constant 0 : index
    %c0_7 = arith.constant 0 : index
    %8 = vector.load %arg6[%c0_6, %c0_7] : memref<16x32xf32, #tpu.memory_space<vmem>>, vector<16x32xf32>
    tpu.vector_store %arg6[%c0_6, %c0_7], %7 {strides = array<i32>} : memref<16x32xf32, #tpu.memory_space<vmem>>, vector<16x32xf32>,
    %c0_i32_8 = arith.constant 0 : i32
    %9 = arith.cmpi eq, %arg2, %c0_i32_8 : i32
    %10 = arith.extui %9 : i1 to i32
    %c0_i32_9 = arith.constant 0 : i32
    %11 = arith.cmpi ne, %10, %c0_i32_9 : i32
    scf.if %11 {
      %c0_10 = arith.constant 0 : index
      %c0_11 = arith.constant 0 : index
      %12 = vector.load %arg6[%c0_10, %c0_11] : memref<16x32xf32, #tpu.memory_space<vmem>>, vector<16x32xf32>
      %c0_12 = arith.constant 0 : index
      %c0_13 = arith.constant 0 : index
      %13 = vector.load %arg5[%c0_12, %c0_13] : memref<16x32xf32, #tpu.memory_space<vmem>>, vector<16x32xf32>
      tpu.vector_store %arg5[%c0_12, %c0_13], %12 {strides = array<i32>} : memref<16x32xf32, #tpu.memory_space<vmem>>, vector<16x32xf32>,
    } else {
    }
    return
  }
  func.func @transform_0(%arg0: i32, %arg1: i32, %arg2: i32) -> (i32, i32) {
    %c0_i32 = arith.constant 0 : i32
    return %arg0, %arg2 : i32, i32
  }
  func.func @transform_1(%arg0: i32, %arg1: i32, %arg2: i32) -> (i32, i32) {
    %c0_i32 = arith.constant 0 : i32
    return %arg2, %arg1 : i32, i32
  }
  func.func @transform_2(%arg0: i32, %arg1: i32, %arg2: i32) -> (i32, i32) {
    %c0_i32 = arith.constant 0 : i32
    return %arg0, %arg1 : i32, i32
  }
}

</mosaic_0001>

<bundles_post_ra>
// kernel: tpu_custom_call.1
= control target key start
LH: loop header
LB: loop body
LE: loop exit
PB: predicated region body
PF: predicated region fallthrough
CT: control target
= control target key end

     0   :  { %7 = vsyncpa [#allocation4], 0  ;;  %s345_s0 = inlined_call_operand.hbm [shape: f32[16,32], index: 0, kind: input, shape index: {}]   ;;  %s346_s1 = inlined_call_operand.hbm [shape: f32[32,32], index: 1, kind: input, shape index: {}]   ;;  %s347_s2 = inlined_call_operand.hbm [shape: f32[16,32], index: 2, kind: output, shape index: {}]  }
   0x1   :  { %8 = vsyncpa [#allocation7], 0 }
   0x2   :  { %9 = vsyncpa [#allocation5], 0  ;;  %s271_s9 = smov [#allocation3]   ;;  %s199_s13 = scalar_lea.hbm %s345_s0, 256 }
   0x3   :  { %s15_s10 = sshll.u32 %s271_s9, 4  ;;  %p200_p0 = scmp.ne.s32.totalorder %s345_s0, %s199_s13  ;;  %s16_s10 = int_to_ptr.vmem [resolvable:$true] %s15_s10 }
   0x4   :  { %p203_p1 = scmp.lt.u32.totalorder %s199_s13, %s345_s0 }
   0x6   :  { %p205_p2 = pnand %p203_p1, %p200_p0 }
   0x8   :  { %208 = shalt.err (!%p205_p2)
}
   0x9   :  { %s209_s18 = scalar_lea.vmem %s16_s10, 256  ;;  %p214_p4 = scmp.lt.s32.totalorder %s16_s10, %s16_s10 }
   0xa   :  { %p210_p3 = scmp.ne.s32.totalorder %s16_s10, %s209_s18  ;;  %p215_p5 = scmp.lt.s32.totalorder %s209_s18, %s209_s18 }
   0xc   :  { %p216_p6 = por %p215_p5, %p214_p4 }
   0xe   :  { %p217_p7 = pnand %p216_p6, %p210_p3 }
  0x10   :  { %220 = shalt.err (!%p217_p7)
}
  0x11   :  { %s272_s19 = smov 128   ;;  %s273_s20 = smov 8  }
  0x12   :  { %21 = dma.hbm_to_vmem [thread:$0]  %s345_s0, 256, %s16_s10, [#allocation4], %s272_s19, %s272_s19, %s273_s20  }
  0x13   :  { %s274_s23 = smov [#allocation6]   ;;  %s221_s27 = scalar_lea.hbm %s346_s1, 512 }
  0x14   :  { %s27_s24 = sshll.u32 %s274_s23, 4  ;;  %p222_p8 = scmp.ne.s32.totalorder %s346_s1, %s221_s27  ;;  %s28_s24 = int_to_ptr.vmem [resolvable:$true] %s27_s24 }
  0x15   :  { %p225_p9 = scmp.lt.u32.totalorder %s221_s27, %s346_s1 }
  0x17   :  { %p227_p10 = pnand %p225_p9, %p222_p8 }
  0x19   :  { %230 = shalt.err (!%p227_p10)
}
  0x1a   :  { %s231_s4 = scalar_lea.vmem %s28_s24, 512  ;;  %p236_p12 = scmp.lt.s32.totalorder %s28_s24, %s28_s24 }
  0x1b   :  { %p232_p11 = scmp.ne.s32.totalorder %s28_s24, %s231_s4  ;;  %p237_p13 = scmp.lt.s32.totalorder %s231_s4, %s231_s4 }
  0x1d   :  { %p238_p0 = por %p237_p13, %p236_p12 }
  0x1f   :  { %p239_p1 = pnand %p238_p0, %p232_p11 }
  0x21   :  { %242 = shalt.err (!%p239_p1)
}
  0x22   :  { %33 = dma.hbm_to_vmem [thread:$0]  %s346_s1, 512, %s28_s24, [#allocation7], %s272_s19, %s272_s19, %s273_s20  }
  0x23   :  { %265 = dma.done.wait [#allocation4], 256  }
  0x24   :  { %266 = vsyncadd [#allocation4], 4294967040 }
  0x25   :  { %267 = dma.done.wait [#allocation7], 512  }
  0x26   :  { %268 = vsyncadd [#allocation7], 4294966784  ;;  %vm44_vm0 = vcmask 261120   ;;  %v275_v0 = vmov 0.0   ;;  %v51_v1 = vld [vmem:[#allocation6] sm:$0xff]  ;;  %v52_v2 = vld [vmem:[#allocation6 + $0x8] sm:$0xff] }
  0x27   :  { %46 = vst.msk [vmem:[#allocation2 + $0x8] sm:$0xff] %vm44_vm0, %v275_v0  ;;  %45 = vst.msk [vmem:[#allocation2] sm:$0xff] %vm44_vm0, %v275_v0  ;;  %v53_v3 = vld [vmem:[#allocation6 + $0x10] sm:$0xff]  ;;  %v185_v4 = vpack.c.bf16 %v52_v2, %v51_v1  ;;  %v54_v5 = vld [vmem:[#allocation6 + $0x18] sm:$0xff]  ;;  %s276_s1 = smov [#allocation8]  }
  0x28   :  { %v49_v6 = vld [vmem:[#allocation3] sm:$0xff]  ;;  %v189_v7 = vpack.c.bf16 %v54_v5, %v53_v3  ;;  %v50_v8 = vld [vmem:[#allocation3 + $0x8] sm:$0xff]  ;;  %s153_s6 = sshll.u32 %s276_s1, 4  ;;  %s154_s6 = int_to_ptr.vmem [resolvable:$true] %s153_s6 }
  0x29   :  { %182 = vmatprep.mubr.msk.f32.mxu0 %vm44_vm0, %v49_v6  ;;  %186 = vmatprep.subr.bf16.mxu0 %v185_v4  ;;  %s243_s7 = scalar_lea.vmem %s154_s6, 256  ;;  %p248_p3 = scmp.lt.s32.totalorder %s154_s6, %s154_s6 }
  0x2a   :  { %188 = vmatpush3.bf16.msra.mxu0 %v185_v4  ;;  %p244_p2 = scmp.ne.s32.totalorder %s154_s6, %s243_s7  ;;  %p249_p4 = scmp.lt.s32.totalorder %s243_s7, %s243_s7 }
  0x2b   :  { %190 = vmatprep.subr.bf16.mxu0 %v189_v7 }
  0x2c   :  { %p250_p5 = por %p249_p4, %p248_p3 }
  0x2e   :  { %192 = vmatpush3.bf16.msra.mxu0 %v189_v7  ;;  %v48_v9 = vld [vmem:[#allocation2 + $0x8] sm:$0xff]  ;;  %v47_v10 = vld [vmem:[#allocation2] sm:$0xff]  ;;  %p251_p6 = pnand %p250_p5, %p244_p2 }
  0x31   :  { %183 = vmatmul.mubr.msk.f32.vlgmr.msra.gmra.mrb[0].mxu0 %vm44_vm0, %v50_v8 }
 0x104   :  { %v184_v11 = vpop.f32.mrb[0].mxu0 }
 0x105   :  { %v138_v12 = vadd.f32 %v184_v11, %v48_v9  ;;  %v128_v13 = vpop.f32.mrb[1].mxu0 }
 0x106   :  { %v137_v14 = vadd.f32 %v128_v13, %v47_v10 }
 0x107   :  { %140 = vst.msk [vmem:[#allocation2 + $0x8] sm:$0xff] %vm44_vm0, %v138_v12 }
 0x108   :  { %139 = vst.msk [vmem:[#allocation2] sm:$0xff] %vm44_vm0, %v137_v14 }
 0x10e   :  { %v145_v15 = vld [vmem:[#allocation2 + $0x8] sm:$0xff] }
 0x10f   :  { %v144_v16 = vld [vmem:[#allocation2] sm:$0xff]  ;;  %147 = vst.msk [vmem:[#allocation8 + $0x8] sm:$0xff] %vm44_vm0, %v145_v15 }
 0x110   :  { %146 = vst.msk [vmem:[#allocation8] sm:$0xff] %vm44_vm0, %v144_v16 }
 0x111   :  { %254 = shalt.err (!%p251_p6)
}
 0x112   :  { %s255_s10 = scalar_lea.hbm %s347_s2, 256 }
 0x113   :  { %p256_p7 = scmp.ne.s32.totalorder %s347_s2, %s255_s10  ;;  %p259_p8 = scmp.lt.u32.totalorder %s255_s10, %s347_s2 }
 0x115   :  { %p261_p9 = pnand %p259_p8, %p256_p7 }
 0x117   :  { %264 = shalt.err (!%p261_p9)
}
 0x118   :  { %159 = dma.vmem_to_hbm [thread:$0]  %s154_s6, 256, %s347_s2, [#allocation5], %s272_s19, %s272_s19, %s273_s20  }
 0x119   :  { %269 = dma.done.wait [#allocation5], 256  }
 0x11a   :  { %270 = vsyncadd [#allocation5], 4294967040 }
 0x11b   :  { %163 = vsyncpa [#allocation4], 1 }
 0x11c   :  { %164 = vsyncpa [#allocation7], 1 }
 0x11d   :  { %165 = vsyncpa [#allocation5], 1 }

</bundles_post_ra>
